<compile_context>
chip_gen: v7x
topology: tpu7x:2x2x1
jax: 0.10.0
libtpu: 0.0.40
codegen_flags: <defaults>
</compile_context>

<pallas_src>
import jax
import jax.numpy as jnp
from jax.experimental import pallas as pl
from jax.experimental.pallas import tpu as pltpu

IN_DIM = 28 * 28
OUT_DIM = 10
OUT_PAD = 128  # lane-dense padded width of the final layer
DIMS = [(IN_DIM, 400), (400, 200), (200, 100), (100, OUT_DIM)]


def mlp_kernel(x_ref,
               w1_ref, b1_ref,
               w2_ref, b2_ref,
               w3_ref, b3_ref,
               w4_ref, b4_ref,
               o_ref):
    """One batch tile: (TB, 784) -> (TB, 128). Weights are VMEM-resident."""
    h = x_ref[...]

    def layer(h, w_ref, b_ref, relu):
        # Weights live in VMEM as bf16 (halved DMA bytes / footprint); upcast
        # on the VPU (hidden under MXU work) and accumulate in f32 on the MXU.
        w = w_ref[...].astype(jnp.float32)
        y = jnp.dot(h, w, preferred_element_type=jnp.float32) + b_ref[...]
        return jnp.maximum(y, 0.0) if relu else y

    h = layer(h, w1_ref, b1_ref, True)
    h = layer(h, w2_ref, b2_ref, True)
    h = layer(h, w3_ref, b3_ref, True)
    h = layer(h, w4_ref, b4_ref, False)   # padded to 128 output lanes
    o_ref[...] = h.astype(o_ref.dtype)


def _round_up(x, m):
    return (x + m - 1) // m * m


def module_net_forward(x, params, *, tb=256):
    """x: (B, 784) f32. params: w1..w4 ((in,out) bf16, w4 padded to 128 cols),
    b1..b4 ((1,out) f32, b4 padded to 128 cols)."""
    B, F = x.shape
    assert F == IN_DIM

    # Batch tile: >=256 rows amortizes per-grid-step overhead (~0.35us) and
    # fills the MXU; for tiny B fall back to the smallest 8-aligned tile.
    tb_eff = min(tb, _round_up(B, 8))
    b_pad = _round_up(B, tb_eff)
    if b_pad != B:
        x = jnp.pad(x, ((0, b_pad - B), (0, 0)))
    grid = (b_pad // tb_eff,)

    def resident(shape):  # same block every grid step -> fetched once
        return pl.BlockSpec(shape, lambda i: (0, 0))

    args = [x]
    in_specs = [pl.BlockSpec((tb_eff, IN_DIM), lambda i: (i, 0))]
    for k in range(1, 5):
        w, b = params[f"w{k}"], params[f"b{k}"]
        args += [w, b]
        in_specs += [resident(w.shape), resident(b.shape)]

    out = pl.pallas_call(
        mlp_kernel,
        out_shape=jax.ShapeDtypeStruct((b_pad, OUT_PAD), jnp.float32),
        grid=grid,
        in_specs=in_specs,
        out_specs=pl.BlockSpec((tb_eff, OUT_PAD), lambda i: (i, 0)),
        compiler_params=pltpu.CompilerParams(
            dimension_semantics=("parallel",),  # megacore: split batch tiles
        ),
    )(*args)
    return out[:B, :OUT_DIM]


def init_params(key):
    """Deterministic init mimicking nn.Linear default (uniform +/- 1/sqrt(fan_in))."""
    params = {}
    keys = jax.random.split(key, 2 * len(DIMS))
    for i, (fan_in, fan_out) in enumerate(DIMS):
        bound = 1.0 / jnp.sqrt(jnp.float32(fan_in))
        params[f"w{i + 1}"] = jax.random.uniform(
            keys[2 * i], (fan_in, fan_out), jnp.float32, -bound, bound)
        params[f"b{i + 1}"] = jax.random.uniform(
            keys[2 * i + 1], (1, fan_out), jnp.float32, -bound, bound)
    return params


def prepare_params(params, weight_dtype=jnp.bfloat16):
    """One-time host-side prep: cast weights to bf16 (halved HBM traffic) and
    zero-pad the final layer 10 -> 128 output features for lane-dense stores."""
    out = {}
    for i in range(1, 5):
        w = params[f"w{i}"].astype(weight_dtype)
        b = params[f"b{i}"].astype(jnp.float32)
        if i == 4:
            w = jnp.pad(w, ((0, 0), (0, OUT_PAD - OUT_DIM)))
            b = jnp.pad(b, ((0, 0), (0, OUT_PAD - OUT_DIM)))
        out[f"w{i}"] = w
        out[f"b{i}"] = b
    return out


def reference_forward(x, params):
    h = x
    for i in range(1, 4):
        h = jnp.maximum(h @ params[f"w{i}"] + params[f"b{i}"], 0.0)
    return h @ params["w4"] + params["b4"]


if __name__ == "__main__":
    key = jax.random.PRNGKey(0)
    k_x, k_p = jax.random.split(key)

    params_f32 = init_params(k_p)
    params = prepare_params(params_f32)  # bf16 weights (padded l4) for kernel
    # Reference uses the same dequantized weights (padding sliced off) so the
    # check isolates the kernel, not the bf16 weight-quantization decision.
    params_ref = {}
    for i in range(1, 5):
        w = params[f"w{i}"].astype(jnp.float32)
        b = params[f"b{i}"]
        if i == 4:
            w, b = w[:, :OUT_DIM], b[:, :OUT_DIM]
        params_ref[f"w{i}"] = w
        params_ref[f"b{i}"] = b

    # Case 1: tiny batch, single tile.  Case 2: exercises the batch grid,
    # padding (40 -> 48) and the parallel batch axis.
    for B, tb in ((8, 256), (40, 16)):
        x = jax.random.normal(k_x, (B, IN_DIM), dtype=jnp.float32)
        out = jax.block_until_ready(module_net_forward(x, params, tb=tb))
        ref = reference_forward(x, params_ref)
        assert out.shape == (B, OUT_DIM)
        assert jnp.allclose(out, ref, atol=1e-3, rtol=1e-3), \
            float(jnp.max(jnp.abs(out - ref)))

    print("KERNEL_OK")
</pallas_src>

<mosaic_0001>
module attributes {stable_mosaic.version = 11 : i64} {
  func.func @mlp_kernel(%arg0: i32, %arg1: memref<8x784xf32, #tpu.memory_space<vmem>>, %arg2: memref<784x400xbf16, #tpu.memory_space<vmem>>, %arg3: memref<1x400xf32, #tpu.memory_space<vmem>>, %arg4: memref<400x200xbf16, #tpu.memory_space<vmem>>, %arg5: memref<1x200xf32, #tpu.memory_space<vmem>>, %arg6: memref<200x100xbf16, #tpu.memory_space<vmem>>, %arg7: memref<1x100xf32, #tpu.memory_space<vmem>>, %arg8: memref<100x128xbf16, #tpu.memory_space<vmem>>, %arg9: memref<1x128xf32, #tpu.memory_space<vmem>>, %arg10: memref<8x128xf32, #tpu.memory_space<vmem>>) attributes {dimension_semantics = [#tpu.dimension_semantics<parallel>], iteration_bounds = array<i64: 1>, scalar_prefetch = 0 : i64, scratch_operands = 0 : i64, tpu.core_type = #tpu.core_type<tc>, window_params = [{transform_indices = @transform_0, window_bounds = array<i64: 8, 784>}, {pipeline_mode = #tpu.pipeline_mode<synchronous>, transform_indices = @transform_1, window_bounds = array<i64: 784, 400>}, {pipeline_mode = #tpu.pipeline_mode<synchronous>, transform_indices = @transform_2, window_bounds = array<i64: 1, 400>}, {pipeline_mode = #tpu.pipeline_mode<synchronous>, transform_indices = @transform_3, window_bounds = array<i64: 400, 200>}, {pipeline_mode = #tpu.pipeline_mode<synchronous>, transform_indices = @transform_4, window_bounds = array<i64: 1, 200>}, {pipeline_mode = #tpu.pipeline_mode<synchronous>, transform_indices = @transform_5, window_bounds = array<i64: 200, 100>}, {pipeline_mode = #tpu.pipeline_mode<synchronous>, transform_indices = @transform_6, window_bounds = array<i64: 1, 100>}, {pipeline_mode = #tpu.pipeline_mode<synchronous>, transform_indices = @transform_7, window_bounds = array<i64: 100, 128>}, {pipeline_mode = #tpu.pipeline_mode<synchronous>, transform_indices = @transform_8, window_bounds = array<i64: 1, 128>}, {transform_indices = @transform_9, window_bounds = array<i64: 8, 128>}]} {
    %c0 = arith.constant 0 : index
    %c0_0 = arith.constant 0 : index
    %0 = vector.load %arg1[%c0, %c0_0] : memref<8x784xf32, #tpu.memory_space<vmem>>, vector<8x784xf32>
    %c0_1 = arith.constant 0 : index
    %c0_2 = arith.constant 0 : index
    %1 = vector.load %arg2[%c0_1, %c0_2] : memref<784x400xbf16, #tpu.memory_space<vmem>>, vector<784x400xbf16>
    %2 = arith.extf %1 : vector<784x400xbf16> to vector<784x400xf32>
    %cst = arith.constant dense<0.000000e+00> : vector<8x400xf32>
    %3 = tpu.matmul %0, %2, %cst {dimension_numbers = #tpu.dot_dimension_numbers<[1], [0], [0], [1], [0, 0, 1, 1], [], []>} : vector<8x784xf32>, vector<784x400xf32>, vector<8x400xf32> -> vector<8x400xf32>
    %c0_3 = arith.constant 0 : index
    %c0_4 = arith.constant 0 : index
    %4 = vector.load %arg3[%c0_3, %c0_4] : memref<1x400xf32, #tpu.memory_space<vmem>>, vector<1x400xf32>
    %5 = vector.broadcast %4 : vector<1x400xf32> to vector<8x400xf32>
    %6 = arith.addf %3, %5 : vector<8x400xf32>
    %cst_5 = arith.constant 0.000000e+00 : f32
    %7 = vector.broadcast %cst_5 : f32 to vector<8x400xf32>
    %8 = arith.maximumf %6, %7 : vector<8x400xf32>
    %c0_6 = arith.constant 0 : index
    %c0_7 = arith.constant 0 : index
    %9 = vector.load %arg4[%c0_6, %c0_7] : memref<400x200xbf16, #tpu.memory_space<vmem>>, vector<400x200xbf16>
    %10 = arith.extf %9 : vector<400x200xbf16> to vector<400x200xf32>
    %cst_8 = arith.constant dense<0.000000e+00> : vector<8x200xf32>
    %11 = tpu.matmul %8, %10, %cst_8 {dimension_numbers = #tpu.dot_dimension_numbers<[1], [0], [0], [1], [0, 0, 1, 1], [], []>} : vector<8x400xf32>, vector<400x200xf32>, vector<8x200xf32> -> vector<8x200xf32>
    %c0_9 = arith.constant 0 : index
    %c0_10 = arith.constant 0 : index
    %12 = vector.load %arg5[%c0_9, %c0_10] : memref<1x200xf32, #tpu.memory_space<vmem>>, vector<1x200xf32>
    %13 = vector.broadcast %12 : vector<1x200xf32> to vector<8x200xf32>
    %14 = arith.addf %11, %13 : vector<8x200xf32>
    %cst_11 = arith.constant 0.000000e+00 : f32
    %15 = vector.broadcast %cst_11 : f32 to vector<8x200xf32>
    %16 = arith.maximumf %14, %15 : vector<8x200xf32>
    %c0_12 = arith.constant 0 : index
    %c0_13 = arith.constant 0 : index
    %17 = vector.load %arg6[%c0_12, %c0_13] : memref<200x100xbf16, #tpu.memory_space<vmem>>, vector<200x100xbf16>
    %18 = arith.extf %17 : vector<200x100xbf16> to vector<200x100xf32>
    %cst_14 = arith.constant dense<0.000000e+00> : vector<8x100xf32>
    %19 = tpu.matmul %16, %18, %cst_14 {dimension_numbers = #tpu.dot_dimension_numbers<[1], [0], [0], [1], [0, 0, 1, 1], [], []>} : vector<8x200xf32>, vector<200x100xf32>, vector<8x100xf32> -> vector<8x100xf32>
    %c0_15 = arith.constant 0 : index
    %c0_16 = arith.constant 0 : index
    %20 = vector.load %arg7[%c0_15, %c0_16] : memref<1x100xf32, #tpu.memory_space<vmem>>, vector<1x100xf32>
    %21 = vector.broadcast %20 : vector<1x100xf32> to vector<8x100xf32>
    %22 = arith.addf %19, %21 : vector<8x100xf32>
    %cst_17 = arith.constant 0.000000e+00 : f32
    %23 = vector.broadcast %cst_17 : f32 to vector<8x100xf32>
    %24 = arith.maximumf %22, %23 : vector<8x100xf32>
    %c0_18 = arith.constant 0 : index
    %c0_19 = arith.constant 0 : index
    %25 = vector.load %arg8[%c0_18, %c0_19] : memref<100x128xbf16, #tpu.memory_space<vmem>>, vector<100x128xbf16>
    %26 = arith.extf %25 : vector<100x128xbf16> to vector<100x128xf32>
    %cst_20 = arith.constant dense<0.000000e+00> : vector<8x128xf32>
    %27 = tpu.matmul %24, %26, %cst_20 {dimension_numbers = #tpu.dot_dimension_numbers<[1], [0], [0], [1], [0, 0, 1, 1], [], []>} : vector<8x100xf32>, vector<100x128xf32>, vector<8x128xf32> -> vector<8x128xf32>
    %c0_21 = arith.constant 0 : index
    %c0_22 = arith.constant 0 : index
    %28 = vector.load %arg9[%c0_21, %c0_22] : memref<1x128xf32, #tpu.memory_space<vmem>>, vector<1x128xf32>
    %29 = vector.broadcast %28 : vector<1x128xf32> to vector<8x128xf32>
    %30 = arith.addf %27, %29 : vector<8x128xf32>
    %c0_23 = arith.constant 0 : index
    %c0_24 = arith.constant 0 : index
    %31 = vector.load %arg10[%c0_23, %c0_24] : memref<8x128xf32, #tpu.memory_space<vmem>>, vector<8x128xf32>
    tpu.vector_store %arg10[%c0_23, %c0_24], %30 {strides = array<i32>} : memref<8x128xf32, #tpu.memory_space<vmem>>, vector<8x128xf32>,
    return
  }
  func.func @transform_0(%arg0: i32) -> (i32, i32) {
    %c0_i32 = arith.constant 0 : i32
    %c0_i32_0 = arith.constant 0 : i32
    return %arg0, %c0_i32 : i32, i32
  }
  func.func @transform_1(%arg0: i32) -> (i32, i32) {
    %c0_i32 = arith.constant 0 : i32
    %c0_i32_0 = arith.constant 0 : i32
    %c0_i32_1 = arith.constant 0 : i32
    return %c0_i32, %c0_i32_0 : i32, i32
  }
  func.func @transform_2(%arg0: i32) -> (i32, i32) {
    %c0_i32 = arith.constant 0 : i32
    %c0_i32_0 = arith.constant 0 : i32
    %c0_i32_1 = arith.constant 0 : i32
    return %c0_i32, %c0_i32_0 : i32, i32
  }
  func.func @transform_3(%arg0: i32) -> (i32, i32) {
    %c0_i32 = arith.constant 0 : i32
    %c0_i32_0 = arith.constant 0 : i32
    %c0_i32_1 = arith.constant 0 : i32
    return %c0_i32, %c0_i32_0 : i32, i32
  }
  func.func @transform_4(%arg0: i32) -> (i32, i32) {
    %c0_i32 = arith.constant 0 : i32
    %c0_i32_0 = arith.constant 0 : i32
    %c0_i32_1 = arith.constant 0 : i32
    return %c0_i32, %c0_i32_0 : i32, i32
  }
  func.func @transform_5(%arg0: i32) -> (i32, i32) {
    %c0_i32 = arith.constant 0 : i32
    %c0_i32_0 = arith.constant 0 : i32
    %c0_i32_1 = arith.constant 0 : i32
    return %c0_i32, %c0_i32_0 : i32, i32
  }
  func.func @transform_6(%arg0: i32) -> (i32, i32) {
    %c0_i32 = arith.constant 0 : i32
    %c0_i32_0 = arith.constant 0 : i32
    %c0_i32_1 = arith.constant 0 : i32
    return %c0_i32, %c0_i32_0 : i32, i32
  }
  func.func @transform_7(%arg0: i32) -> (i32, i32) {
    %c0_i32 = arith.constant 0 : i32
    %c0_i32_0 = arith.constant 0 : i32
    %c0_i32_1 = arith.constant 0 : i32
    return %c0_i32, %c0_i32_0 : i32, i32
  }
  func.func @transform_8(%arg0: i32) -> (i32, i32) {
    %c0_i32 = arith.constant 0 : i32
    %c0_i32_0 = arith.constant 0 : i32
    %c0_i32_1 = arith.constant 0 : i32
    return %c0_i32, %c0_i32_0 : i32, i32
  }
  func.func @transform_9(%arg0: i32) -> (i32, i32) {
    %c0_i32 = arith.constant 0 : i32
    %c0_i32_0 = arith.constant 0 : i32
    return %arg0, %c0_i32 : i32, i32
  }
}

</mosaic_0001>

<bundles_post_ra>
// kernel: tpu_custom_call.1
= control target key start
LH: loop header
LB: loop body
LE: loop exit
PB: predicated region body
PF: predicated region fallthrough
CT: control target
= control target key end

     0   :  { %v3142_v2 = vmov 0.0   ;;  %vm650_vm0 = vcmask 130048   ;;  %s4088_s0 = inlined_call_operand.vmem [shape: f32[8,784], index: 0, kind: input, shape index: {}]   ;;  %s4089_s1 = inlined_call_operand.vmem [shape: bf16[784,400], index: 1, kind: input, shape index: {}]   ;;  %s4090_s2 = inlined_call_operand.vmem [shape: f32[1,400], index: 2, kind: input, shape index: {}]   ;;  %s4091_s3 = inlined_call_operand.vmem [shape: bf16[400,200], index: 3, kind: input, shape index: {}]   ;;  %s4092_s4 = inlined_call_operand.vmem [shape: f32[1,200], index: 4, kind: input, shape index: {}]   ;;  %s4093_s5 = inlined_call_operand.vmem [shape: bf16[200,100], index: 5, kind: input, shape index: {}]   ;;  %s4094_s6 = inlined_call_operand.vmem [shape: f32[1,100], index: 6, kind: input, shape index: {}]   ;;  %s4095_s7 = inlined_call_operand.vmem [shape: bf16[100,128], index: 7, kind: input, shape index: {}]   ;;  %s4096_s8 = inlined_call_operand.vmem [shape: f32[1,128], index: 8, kind: input, shape index: {}]   ;;  %s4097_s9 = inlined_call_operand.hbm [shape: f32[8,128], index: 9, kind: output, shape index: {}]  }
   0x1   :  { %v2748_v0 = vld [vmem:[%s4089_s1 + $0x4] ss:$16 sps:$4 sm:$0xff]   ;;  %931 = vmatprep.mubr.f32.mxu1 %v3142_v2  ;;  %v2752_v3 = vld [vmem:[%s4089_s1] ss:$16 sps:$4 sm:$0xff]   ;;  %v2756_v6 = vld [vmem:[%s4089_s1 + $0xc] ss:$16 sps:$4 sm:$0xff]  }
   0x2   :  { %v2750_v1 = vld [vmem:[%s4089_s1 + $0x604] ss:$16 sps:$4 sm:$0xff]   ;;  %1933 = vmatprep.subr.bf16.mxu0 %v2748_v0  ;;  %v2753_v4 = vld [vmem:[%s4089_s1 + $0x600] ss:$16 sps:$4 sm:$0xff]   ;;  %v2758_v7 = vld [vmem:[%s4089_s1 + $0x8] ss:$16 sps:$4 sm:$0xff]  }
   0x3   :  { %2125 = vmatprep.subr.bf16.mxu1 %v2750_v1  ;;  %v2754_v5 = vld [vmem:[%s4089_s1 + $0x24] ss:$16 sps:$4 sm:$0xff]   ;;  %1935 = vmatpush1.bf16.msra.mxu0 %v2752_v3  ;;  %v2759_v8 = vld [vmem:[%s4089_s1 + $0x20] ss:$16 sps:$4 sm:$0xff]   ;;  %v2762_v11 = vld [vmem:[%s4089_s1 + $0x2c] ss:$16 sps:$4 sm:$0xff]  }
   0x4   :  { %2127 = vmatpush1.bf16.msra.mxu1 %v2753_v4  ;;  %1937 = vmatprep.subr.bf16.mxu0 %v2754_v5  ;;  %v39_v9 = vld [vmem:[%s4088_s0 + $0x30] sm:$0xff]  ;;  %v2764_v12 = vld [vmem:[%s4089_s1 + $0x28] ss:$16 sps:$4 sm:$0xff]   ;;  %v2768_v15 = vld [vmem:[%s4089_s1 + $0x4c] ss:$16 sps:$4 sm:$0xff]  }
   0x5   :  { %2129 = vmatprep.subr.bf16.mxu1 %v2756_v6  ;;  %v2760_v10 = vld [vmem:[%s4089_s1 + $0x44] ss:$16 sps:$4 sm:$0xff]   ;;  %v2765_v13 = vld [vmem:[%s4089_s1 + $0x40] ss:$16 sps:$4 sm:$0xff]   ;;  %v2770_v16 = vld [vmem:[%s4089_s1 + $0x48] ss:$16 sps:$4 sm:$0xff]  }
   0x6   :  { %v2766_v14 = vld [vmem:[%s4089_s1 + $0x64] ss:$16 sps:$4 sm:$0xff]   ;;  %v2771_v17 = vld [vmem:[%s4089_s1 + $0x60] ss:$16 sps:$4 sm:$0xff]   ;;  %v2774_v19 = vld [vmem:[%s4089_s1 + $0x6c] ss:$16 sps:$4 sm:$0xff]  }
   0x7   :  { %1793 = vmatmul.mubr.msk.f32.vlgmr.msra.gmra.mrb[0].mxu1 %vm650_vm0, %v39_v9  ;;  %1939 = vmatpush1.bf16.msra.mxu0 %v2759_v8  ;;  %v2772_v18 = vld [vmem:[%s4089_s1 + $0x84] ss:$16 sps:$4 sm:$0xff]   ;;  %v2776_v20 = vld [vmem:[%s4089_s1 + $0x68] ss:$16 sps:$4 sm:$0xff]   ;;  %v2777_v21 = vld [vmem:[%s4089_s1 + $0x80] ss:$16 sps:$4 sm:$0xff]  }
   0x8   :  { %2131 = vmatpush1.bf16.msra.mxu1 %v2758_v7  ;;  %1941 = vmatprep.subr.bf16.mxu0 %v2760_v10  ;;  %v2778_v22 = vld [vmem:[%s4089_s1 + $0xa4] ss:$16 sps:$4 sm:$0xff]   ;;  %v2780_v23 = vld [vmem:[%s4089_s1 + $0x8c] ss:$16 sps:$4 sm:$0xff]   ;;  %v2782_v24 = vld [vmem:[%s4089_s1 + $0x88] ss:$16 sps:$4 sm:$0xff]  }
   0x9   :  { %2133 = vmatprep.subr.bf16.mxu1 %v2762_v11  ;;  %v2783_v25 = vld [vmem:[%s4089_s1 + $0xa0] ss:$16 sps:$4 sm:$0xff]   ;;  %v2784_v26 = vld [vmem:[%s4089_s1 + $0xc4] ss:$16 sps:$4 sm:$0xff]   ;;  %v2786_v27 = vld [vmem:[%s4089_s1 + $0xac] ss:$16 sps:$4 sm:$0xff]  }
   0xa   :  { %v2788_v28 = vld [vmem:[%s4089_s1 + $0xa8] ss:$16 sps:$4 sm:$0xff]   ;;  %v2789_v29 = vld [vmem:[%s4089_s1 + $0xc0] ss:$16 sps:$4 sm:$0xff]   ;;  %v2790_v30 = vld [vmem:[%s4089_s1 + $0xe4] ss:$16 sps:$4 sm:$0xff]  }
   0xb   :  { %1943 = vmatpush1.bf16.msra.mxu0 %v2765_v13  ;;  %v2792_v31 = vld [vmem:[%s4089_s1 + $0xcc] ss:$16 sps:$4 sm:$0xff]   ;;  %v2794_v32 = vld [vmem:[%s4089_s1 + $0xc8] ss:$16 sps:$4 sm:$0xff]   ;;  %v2795_v33 = vld [vmem:[%s4089_s1 + $0xe0] ss:$16 sps:$4 sm:$0xff]  }
   0xc   :  { %2135 = vmatpush1.bf16.msra.mxu1 %v2764_v12  ;;  %1945 = vmatprep.subr.bf16.mxu0 %v2766_v14  ;;  %v2796_v34 = vld [vmem:[%s4089_s1 + $0x104] ss:$16 sps:$4 sm:$0xff]   ;;  %v2798_v35 = vld [vmem:[%s4089_s1 + $0xec] ss:$16 sps:$4 sm:$0xff]   ;;  %v2800_v36 = vld [vmem:[%s4089_s1 + $0xe8] ss:$16 sps:$4 sm:$0xff]  }
   0xd   :  { %2137 = vmatprep.subr.bf16.mxu1 %v2768_v15  ;;  %v2801_v37 = vld [vmem:[%s4089_s1 + $0x100] ss:$16 sps:$4 sm:$0xff]   ;;  %v2802_v38 = vld [vmem:[%s4089_s1 + $0x124] ss:$16 sps:$4 sm:$0xff]   ;;  %v2804_v39 = vld [vmem:[%s4089_s1 + $0x10c] ss:$16 sps:$4 sm:$0xff]  }
   0xe   :  { %v2806_v40 = vld [vmem:[%s4089_s1 + $0x108] ss:$16 sps:$4 sm:$0xff]   ;;  %v2807_v41 = vld [vmem:[%s4089_s1 + $0x120] ss:$16 sps:$4 sm:$0xff]   ;;  %v2808_v42 = vld [vmem:[%s4089_s1 + $0x144] ss:$16 sps:$4 sm:$0xff]  }
   0xf   :  { %1947 = vmatpush1.bf16.msra.mxu0 %v2771_v17  ;;  %v2810_v43 = vld [vmem:[%s4089_s1 + $0x12c] ss:$16 sps:$4 sm:$0xff]   ;;  %v2812_v44 = vld [vmem:[%s4089_s1 + $0x128] ss:$16 sps:$4 sm:$0xff]   ;;  %v2813_v45 = vld [vmem:[%s4089_s1 + $0x140] ss:$16 sps:$4 sm:$0xff]  }
  0x10   :  { %2139 = vmatpush1.bf16.msra.mxu1 %v2770_v16  ;;  %1949 = vmatprep.subr.bf16.mxu0 %v2772_v18  ;;  %v2814_v46 = vld [vmem:[%s4089_s1 + $0x164] ss:$16 sps:$4 sm:$0xff]   ;;  %v2816_v47 = vld [vmem:[%s4089_s1 + $0x14c] ss:$16 sps:$4 sm:$0xff]   ;;  %v2818_v49 = vld [vmem:[%s4089_s1 + $0x148] ss:$16 sps:$4 sm:$0xff]  }
  0x11   :  { %2141 = vmatprep.subr.bf16.mxu1 %v2774_v19  ;;  %v34_v48 = vld [vmem:[%s4088_s0 + $0x8] sm:$0xff]  ;;  %v2819_v50 = vld [vmem:[%s4089_s1 + $0x160] ss:$16 sps:$4 sm:$0xff]   ;;  %v2820_v51 = vld [vmem:[%s4089_s1 + $0x184] ss:$16 sps:$4 sm:$0xff]  }
  0x12   :  { %v2822_v52 = vld [vmem:[%s4089_s1 + $0x16c] ss:$16 sps:$4 sm:$0xff]   ;;  %718 = vmatprep.mubr.f32.mxu0 %v34_v48  ;;  %1002 = vmatprep.mubr.f32.mxu1 %v34_v48  ;;  %v2824_v53 = vld [vmem:[%s4089_s1 + $0x168] ss:$16 sps:$4 sm:$0xff]   ;;  %v2825_v54 = vld [vmem:[%s4089_s1 + $0x180] ss:$16 sps:$4 sm:$0xff]  }
  0x13   :  { %1951 = vmatpush1.bf16.msra.mxu0 %v2777_v21  ;;  %v2826_v55 = vld [vmem:[%s4089_s1 + $0x1a4] ss:$16 sps:$4 sm:$0xff]   ;;  %v2828_v56 = vld [vmem:[%s4089_s1 + $0x18c] ss:$16 sps:$4 sm:$0xff]   ;;  %v2830_v57 = vld [vmem:[%s4089_s1 + $0x188] ss:$16 sps:$4 sm:$0xff]  }
  0x14   :  { %2143 = vmatpush1.bf16.msra.mxu1 %v2776_v20  ;;  %1953 = vmatprep.subr.bf16.mxu0 %v2778_v22  ;;  %v2831_v58 = vld [vmem:[%s4089_s1 + $0x1a0] ss:$16 sps:$4 sm:$0xff]   ;;  %v2832_v59 = vld [vmem:[%s4089_s1 + $0x1c4] ss:$16 sps:$4 sm:$0xff]   ;;  %v2834_v60 = vld [vmem:[%s4089_s1 + $0x1ac] ss:$16 sps:$4 sm:$0xff]  }
  0x15   :  { %2145 = vmatprep.subr.bf16.mxu1 %v2780_v23  ;;  %v2836_v61 = vld [vmem:[%s4089_s1 + $0x1a8] ss:$16 sps:$4 sm:$0xff]   ;;  %v2837_v62 = vld [vmem:[%s4089_s1 + $0x1c0] ss:$16 sps:$4 sm:$0xff]   ;;  %v2838_v63 = vld [vmem:[%s4089_s1 + $0x1e4] ss:$16 sps:$4 sm:$0xff]  }
  0x16   :  { %v2840_v0 = vld [vmem:[%s4089_s1 + $0x1cc] ss:$16 sps:$4 sm:$0xff]   ;;  %v2842_v1 = vld [vmem:[%s4089_s1 + $0x1c8] ss:$16 sps:$4 sm:$0xff]   ;;  %v2843_v3 = vld [vmem:[%s4089_s1 + $0x1e0] ss:$16 sps:$4 sm:$0xff]  }
  0x17   :  { %1955 = vmatpush1.bf16.msra.mxu0 %v2783_v25  ;;  %v2844_v4 = vld [vmem:[%s4089_s1 + $0x204] ss:$16 sps:$4 sm:$0xff]   ;;  %v2847_v5 = vld [vmem:[%s4089_s1 + $0x1ec] ss:$16 sps:$4 sm:$0xff]   ;;  %v2846_v6 = vld [vmem:[%s4089_s1 + $0x200] ss:$16 sps:$4 sm:$0xff]  }
  0x18   :  { %2147 = vmatpush1.bf16.msra.mxu1 %v2782_v24  ;;  %1957 = vmatprep.subr.bf16.mxu0 %v2784_v26  ;;  %v2849_v7 = vld [vmem:[%s4089_s1 + $0x1e8] ss:$16 sps:$4 sm:$0xff]   ;;  %v33_v8 = vld [vmem:[%s4088_s0] sm:$0xff]  ;;  %v2853_v10 = vld [vmem:[%s4089_s1 + $0x20c] ss:$16 sps:$4 sm:$0xff]  }
  0x19   :  { %2149 = vmatprep.subr.bf16.mxu1 %v2786_v27  ;;  %v2850_v9 = vld [vmem:[%s4089_s1 + $0x224] ss:$16 sps:$4 sm:$0xff]   ;;  %v2852_v11 = vld [vmem:[%s4089_s1 + $0x220] ss:$16 sps:$4 sm:$0xff]   ;;  %v2855_v12 = vld [vmem:[%s4089_s1 + $0x208] ss:$16 sps:$4 sm:$0xff]  }
  0x1a   :  { %v2856_v13 = vld [vmem:[%s4089_s1 + $0x244] ss:$16 sps:$4 sm:$0xff]   ;;  %v2859_v14 = vld [vmem:[%s4089_s1 + $0x22c] ss:$16 sps:$4 sm:$0xff]   ;;  %v2858_v15 = vld [vmem:[%s4089_s1 + $0x240] ss:$16 sps:$4 sm:$0xff]  }
  0x1b   :  { %1959 = vmatpush1.bf16.msra.mxu0 %v2789_v29  ;;  %v2861_v16 = vld [vmem:[%s4089_s1 + $0x228] ss:$16 sps:$4 sm:$0xff]   ;;  %v2862_v17 = vld [vmem:[%s4089_s1 + $0x264] ss:$16 sps:$4 sm:$0xff]   ;;  %v2865_v18 = vld [vmem:[%s4089_s1 + $0x24c] ss:$16 sps:$4 sm:$0xff]  }
  0x1c   :  { %2151 = vmatpush1.bf16.msra.mxu1 %v2788_v28  ;;  %1961 = vmatprep.subr.bf16.mxu0 %v2790_v30  ;;  %v2864_v19 = vld [vmem:[%s4089_s1 + $0x260] ss:$16 sps:$4 sm:$0xff]   ;;  %v2867_v20 = vld [vmem:[%s4089_s1 + $0x248] ss:$16 sps:$4 sm:$0xff]   ;;  %v2868_v21 = vld [vmem:[%s4089_s1 + $0x284] ss:$16 sps:$4 sm:$0xff]  }
  0x1d   :  { %2153 = vmatprep.subr.bf16.mxu1 %v2792_v31  ;;  %v2871_v22 = vld [vmem:[%s4089_s1 + $0x26c] ss:$16 sps:$4 sm:$0xff]   ;;  %v2870_v23 = vld [vmem:[%s4089_s1 + $0x280] ss:$16 sps:$4 sm:$0xff]   ;;  %v2873_v24 = vld [vmem:[%s4089_s1 + $0x268] ss:$16 sps:$4 sm:$0xff]  }
  0x1e   :  { %v2874_v25 = vld [vmem:[%s4089_s1 + $0x2a4] ss:$16 sps:$4 sm:$0xff]   ;;  %v2877_v26 = vld [vmem:[%s4089_s1 + $0x28c] ss:$16 sps:$4 sm:$0xff]   ;;  %v2876_v27 = vld [vmem:[%s4089_s1 + $0x2a0] ss:$16 sps:$4 sm:$0xff]  }
  0x1f   :  { %1963 = vmatpush1.bf16.msra.mxu0 %v2795_v33  ;;  %v2879_v28 = vld [vmem:[%s4089_s1 + $0x288] ss:$16 sps:$4 sm:$0xff]   ;;  %v2880_v29 = vld [vmem:[%s4089_s1 + $0x2c4] ss:$16 sps:$4 sm:$0xff]   ;;  %v2883_v30 = vld [vmem:[%s4089_s1 + $0x2ac] ss:$16 sps:$4 sm:$0xff]  }
  0x20   :  { %2155 = vmatpush1.bf16.msra.mxu1 %v2794_v32  ;;  %1965 = vmatprep.subr.bf16.mxu0 %v2796_v34  ;;  %v36_v31 = vld [vmem:[%s4088_s0 + $0x18] sm:$0xff]  ;;  %v2882_v32 = vld [vmem:[%s4089_s1 + $0x2c0] ss:$16 sps:$4 sm:$0xff]   ;;  %v2886_v34 = vld [vmem:[%s4089_s1 + $0x2e4] ss:$16 sps:$4 sm:$0xff]  }
  0x21   :  { %2157 = vmatprep.subr.bf16.mxu1 %v2798_v35  ;;  %v2885_v33 = vld [vmem:[%s4089_s1 + $0x2a8] ss:$16 sps:$4 sm:$0xff]   ;;  %v2889_v35 = vld [vmem:[%s4089_s1 + $0x2cc] ss:$16 sps:$4 sm:$0xff]   ;;  %v2906_v48 = vld [vmem:[%s4089_s1 + $0x340] ss:$16 sps:$4 sm:$0xff]  }
  0x23   :  { %1967 = vmatpush1.bf16.msra.mxu0 %v2801_v37  ;;  %v2891_v37 = vld [vmem:[%s4089_s1 + $0x2c8] ss:$16 sps:$4 sm:$0xff]  }
  0x24   :  { %2159 = vmatpush1.bf16.msra.mxu1 %v2800_v36  ;;  %1969 = vmatprep.subr.bf16.mxu0 %v2802_v38  ;;  %v2888_v36 = vld [vmem:[%s4089_s1 + $0x2e0] ss:$16 sps:$4 sm:$0xff]   ;;  %v2892_v38 = vld [vmem:[%s4089_s1 + $0x304] ss:$16 sps:$4 sm:$0xff]  }
  0x25   :  { %2161 = vmatprep.subr.bf16.mxu1 %v2804_v39  ;;  %v2895_v39 = vld [vmem:[%s4089_s1 + $0x2ec] ss:$16 sps:$4 sm:$0xff]  }
  0x27   :  { %1971 = vmatpush1.bf16.msra.mxu0 %v2807_v41  ;;  %v2897_v41 = vld [vmem:[%s4089_s1 + $0x2e8] ss:$16 sps:$4 sm:$0xff]  }
  0x28   :  { %2163 = vmatpush1.bf16.msra.mxu1 %v2806_v40  ;;  %1973 = vmatprep.subr.bf16.mxu0 %v2808_v42  ;;  %v2894_v40 = vld [vmem:[%s4089_s1 + $0x300] ss:$16 sps:$4 sm:$0xff]   ;;  %v2898_v42 = vld [vmem:[%s4089_s1 + $0x324] ss:$16 sps:$4 sm:$0xff]  }
  0x29   :  { %2165 = vmatprep.subr.bf16.mxu1 %v2810_v43  ;;  %v2901_v43 = vld [vmem:[%s4089_s1 + $0x30c] ss:$16 sps:$4 sm:$0xff]  }
  0x2b   :  { %1975 = vmatpush1.bf16.msra.mxu0 %v2813_v45  ;;  %v2903_v45 = vld [vmem:[%s4089_s1 + $0x308] ss:$16 sps:$4 sm:$0xff]  }
  0x2c   :  { %2167 = vmatpush1.bf16.msra.mxu1 %v2812_v44  ;;  %1977 = vmatprep.subr.bf16.mxu0 %v2814_v46  ;;  %v2900_v44 = vld [vmem:[%s4089_s1 + $0x320] ss:$16 sps:$4 sm:$0xff]   ;;  %v2904_v46 = vld [vmem:[%s4089_s1 + $0x344] ss:$16 sps:$4 sm:$0xff]  }
  0x2d   :  { %2169 = vmatprep.subr.bf16.mxu1 %v2816_v47  ;;  %v2907_v47 = vld [vmem:[%s4089_s1 + $0x32c] ss:$16 sps:$4 sm:$0xff]  }
  0x2f   :  { %1979 = vmatpush1.bf16.msra.mxu0 %v2819_v50  ;;  %v2910_v50 = vld [vmem:[%s4089_s1 + $0x364] ss:$16 sps:$4 sm:$0xff]  }
  0x30   :  { %2171 = vmatpush1.bf16.msra.mxu1 %v2818_v49  ;;  %1981 = vmatprep.subr.bf16.mxu0 %v2820_v51  ;;  %v2909_v49 = vld [vmem:[%s4089_s1 + $0x328] ss:$16 sps:$4 sm:$0xff]   ;;  %v2913_v51 = vld [vmem:[%s4089_s1 + $0x34c] ss:$16 sps:$4 sm:$0xff]  }
  0x31   :  { %2173 = vmatprep.subr.bf16.mxu1 %v2822_v52  ;;  %v2912_v52 = vld [vmem:[%s4089_s1 + $0x360] ss:$16 sps:$4 sm:$0xff]  }
  0x33   :  { %1983 = vmatpush1.bf16.msra.mxu0 %v2825_v54  ;;  %v2916_v54 = vld [vmem:[%s4089_s1 + $0x384] ss:$16 sps:$4 sm:$0xff]  }
  0x34   :  { %2175 = vmatpush1.bf16.msra.mxu1 %v2824_v53  ;;  %1985 = vmatprep.subr.bf16.mxu0 %v2826_v55  ;;  %v2915_v53 = vld [vmem:[%s4089_s1 + $0x348] ss:$16 sps:$4 sm:$0xff]   ;;  %v2919_v55 = vld [vmem:[%s4089_s1 + $0x36c] ss:$16 sps:$4 sm:$0xff]  }
  0x35   :  { %2177 = vmatprep.subr.bf16.mxu1 %v2828_v56  ;;  %v2918_v56 = vld [vmem:[%s4089_s1 + $0x380] ss:$16 sps:$4 sm:$0xff]  }
  0x37   :  { %1987 = vmatpush1.bf16.msra.mxu0 %v2831_v58  ;;  %v2922_v58 = vld [vmem:[%s4089_s1 + $0x3a4] ss:$16 sps:$4 sm:$0xff]  }
  0x38   :  { %2179 = vmatpush1.bf16.msra.mxu1 %v2830_v57  ;;  %1989 = vmatprep.subr.bf16.mxu0 %v2832_v59  ;;  %v2921_v57 = vld [vmem:[%s4089_s1 + $0x368] ss:$16 sps:$4 sm:$0xff]   ;;  %v2925_v59 = vld [vmem:[%s4089_s1 + $0x38c] ss:$16 sps:$4 sm:$0xff]  }
  0x39   :  { %2181 = vmatprep.subr.bf16.mxu1 %v2834_v60  ;;  %v2924_v60 = vld [vmem:[%s4089_s1 + $0x3a0] ss:$16 sps:$4 sm:$0xff]  }
  0x3b   :  { %1991 = vmatpush1.bf16.msra.mxu0 %v2837_v62  ;;  %v2928_v62 = vld [vmem:[%s4089_s1 + $0x3c4] ss:$16 sps:$4 sm:$0xff]  }
  0x3c   :  { %2183 = vmatpush1.bf16.msra.mxu1 %v2836_v61  ;;  %1993 = vmatprep.subr.bf16.mxu0 %v2838_v63  ;;  %v2927_v61 = vld [vmem:[%s4089_s1 + $0x388] ss:$16 sps:$4 sm:$0xff]   ;;  %v2931_v63 = vld [vmem:[%s4089_s1 + $0x3ac] ss:$16 sps:$4 sm:$0xff]  }
  0x3d   :  { %2185 = vmatprep.subr.bf16.mxu1 %v2840_v0  ;;  %v2930_v0 = vld [vmem:[%s4089_s1 + $0x3c0] ss:$16 sps:$4 sm:$0xff]  }
  0x3f   :  { %1995 = vmatpush1.bf16.msra.mxu0 %v2843_v3  ;;  %v2934_v3 = vld [vmem:[%s4089_s1 + $0x3e4] ss:$16 sps:$4 sm:$0xff]  }
  0x40   :  { %2187 = vmatpush1.bf16.msra.mxu1 %v2842_v1  ;;  %1997 = vmatprep.subr.bf16.mxu0 %v2844_v4  ;;  %v2933_v1 = vld [vmem:[%s4089_s1 + $0x3a8] ss:$16 sps:$4 sm:$0xff]   ;;  %v2937_v4 = vld [vmem:[%s4089_s1 + $0x3cc] ss:$16 sps:$4 sm:$0xff]  }
  0x41   :  { %2189 = vmatprep.subr.bf16.mxu1 %v2847_v5  ;;  %v2936_v5 = vld [vmem:[%s4089_s1 + $0x3e0] ss:$16 sps:$4 sm:$0xff]  }
  0x42   :  { %719 = vmatmul.mubr.f32.vlgmr.msra.gmra.mrb[0].mxu0 %v33_v8 }
  0x43   :  { %1999 = vmatpush1.bf16.msra.mxu0 %v2846_v6  ;;  %789 = vmatprep.mubr.f32.mxu0 %v36_v31  ;;  %v2939_v6 = vld [vmem:[%s4089_s1 + $0x3c8] ss:$16 sps:$4 sm:$0xff]  }
  0x44   :  { %2191 = vmatpush1.bf16.msra.mxu1 %v2849_v7  ;;  %2001 = vmatprep.subr.bf16.mxu0 %v2850_v9  ;;  %v2940_v7 = vld [vmem:[%s4089_s1 + $0x404] ss:$16 sps:$4 sm:$0xff]   ;;  %v2942_v9 = vld [vmem:[%s4089_s1 + $0x400] ss:$16 sps:$4 sm:$0xff]  }
  0x45   :  { %2193 = vmatprep.subr.bf16.mxu1 %v2853_v10  ;;  %v2945_v10 = vld [vmem:[%s4089_s1 + $0x3e8] ss:$16 sps:$4 sm:$0xff]  }
  0x47   :  { %1003 = vmatmul.mubr.f32.vlgmr.msra.gmra.mrb[2].mxu1 %v33_v8  ;;  %2003 = vmatpush1.bf16.msra.mxu0 %v2852_v11  ;;  %v2943_v8 = vld [vmem:[%s4089_s1 + $0x3ec] ss:$16 sps:$4 sm:$0xff]   ;;  %v35_v11 = vld [vmem:[%s4088_s0 + $0x10] sm:$0xff] }
  0x48   :  { %2195 = vmatpush1.bf16.msra.mxu1 %v2855_v12  ;;  %2005 = vmatprep.subr.bf16.mxu0 %v2856_v13  ;;  %v2946_v12 = vld [vmem:[%s4089_s1 + $0x424] ss:$16 sps:$4 sm:$0xff]   ;;  %v2949_v13 = vld [vmem:[%s4089_s1 + $0x40c] ss:$16 sps:$4 sm:$0xff]  }
  0x49   :  { %2197 = vmatprep.subr.bf16.mxu1 %v2859_v14  ;;  %1073 = vmatprep.mubr.f32.mxu1 %v36_v31  ;;  %v2948_v14 = vld [vmem:[%s4089_s1 + $0x420] ss:$16 sps:$4 sm:$0xff]  }
  0x4a   :  { %v2972_v31 = vld [vmem:[%s4089_s1 + $0x4a0] ss:$16 sps:$4 sm:$0xff]  }
  0x4b   :  { %2007 = vmatpush1.bf16.msra.mxu0 %v2858_v15  ;;  %v38_v15 = vld [vmem:[%s4088_s0 + $0x28] sm:$0xff] }
  0x4c   :  { %2199 = vmatpush1.bf16.msra.mxu1 %v2861_v16  ;;  %2009 = vmatprep.subr.bf16.mxu0 %v2862_v17  ;;  %v2951_v16 = vld [vmem:[%s4089_s1 + $0x408] ss:$16 sps:$4 sm:$0xff]   ;;  %v2952_v17 = vld [vmem:[%s4089_s1 + $0x444] ss:$16 sps:$4 sm:$0xff]  }
  0x4d   :  { %2201 = vmatprep.subr.bf16.mxu1 %v2865_v18  ;;  %v2955_v18 = vld [vmem:[%s4089_s1 + $0x42c] ss:$16 sps:$4 sm:$0xff]  }
  0x4f   :  { %2011 = vmatpush1.bf16.msra.mxu0 %v2864_v19  ;;  %v2954_v19 = vld [vmem:[%s4089_s1 + $0x440] ss:$16 sps:$4 sm:$0xff]  }
  0x50   :  { %2203 = vmatpush1.bf16.msra.mxu1 %v2867_v20  ;;  %2013 = vmatprep.subr.bf16.mxu0 %v2868_v21  ;;  %v2957_v20 = vld [vmem:[%s4089_s1 + $0x428] ss:$16 sps:$4 sm:$0xff]   ;;  %v2958_v21 = vld [vmem:[%s4089_s1 + $0x464] ss:$16 sps:$4 sm:$0xff]  }
  0x51   :  { %2205 = vmatprep.subr.bf16.mxu1 %v2871_v22  ;;  %v2961_v22 = vld [vmem:[%s4089_s1 + $0x44c] ss:$16 sps:$4 sm:$0xff]  }
  0x53   :  { %2015 = vmatpush1.bf16.msra.mxu0 %v2870_v23  ;;  %v2960_v23 = vld [vmem:[%s4089_s1 + $0x460] ss:$16 sps:$4 sm:$0xff]  }
  0x54   :  { %2207 = vmatpush1.bf16.msra.mxu1 %v2873_v24  ;;  %2017 = vmatprep.subr.bf16.mxu0 %v2874_v25  ;;  %v2963_v24 = vld [vmem:[%s4089_s1 + $0x448] ss:$16 sps:$4 sm:$0xff]   ;;  %v2964_v25 = vld [vmem:[%s4089_s1 + $0x484] ss:$16 sps:$4 sm:$0xff]  }
  0x55   :  { %2209 = vmatprep.subr.bf16.mxu1 %v2877_v26  ;;  %v2967_v26 = vld [vmem:[%s4089_s1 + $0x46c] ss:$16 sps:$4 sm:$0xff]  }
  0x57   :  { %2019 = vmatpush1.bf16.msra.mxu0 %v2876_v27  ;;  %v2966_v27 = vld [vmem:[%s4089_s1 + $0x480] ss:$16 sps:$4 sm:$0xff]  }
  0x58   :  { %2211 = vmatpush1.bf16.msra.mxu1 %v2879_v28  ;;  %2021 = vmatprep.subr.bf16.mxu0 %v2880_v29  ;;  %v2969_v28 = vld [vmem:[%s4089_s1 + $0x468] ss:$16 sps:$4 sm:$0xff]   ;;  %v2970_v29 = vld [vmem:[%s4089_s1 + $0x4a4] ss:$16 sps:$4 sm:$0xff]  }
  0x59   :  { %2213 = vmatprep.subr.bf16.mxu1 %v2883_v30  ;;  %v2973_v30 = vld [vmem:[%s4089_s1 + $0x48c] ss:$16 sps:$4 sm:$0xff]  }
  0x5b   :  { %2023 = vmatpush1.bf16.msra.mxu0 %v2882_v32  ;;  %v2975_v32 = vld [vmem:[%s4089_s1 + $0x488] ss:$16 sps:$4 sm:$0xff]  }
  0x5c   :  { %2215 = vmatpush1.bf16.msra.mxu1 %v2885_v33  ;;  %2025 = vmatprep.subr.bf16.mxu0 %v2886_v34  ;;  %v2976_v33 = vld [vmem:[%s4089_s1 + $0x4c4] ss:$16 sps:$4 sm:$0xff]   ;;  %v2979_v34 = vld [vmem:[%s4089_s1 + $0x4ac] ss:$16 sps:$4 sm:$0xff]  }
  0x5d   :  { %2217 = vmatprep.subr.bf16.mxu1 %v2889_v35  ;;  %v2978_v35 = vld [vmem:[%s4089_s1 + $0x4c0] ss:$16 sps:$4 sm:$0xff]  }
  0x5f   :  { %2027 = vmatpush1.bf16.msra.mxu0 %v2888_v36  ;;  %v2981_v36 = vld [vmem:[%s4089_s1 + $0x4a8] ss:$16 sps:$4 sm:$0xff]  }
  0x60   :  { %2219 = vmatpush1.bf16.msra.mxu1 %v2891_v37  ;;  %2029 = vmatprep.subr.bf16.mxu0 %v2892_v38  ;;  %v2982_v37 = vld [vmem:[%s4089_s1 + $0x4e4] ss:$16 sps:$4 sm:$0xff]   ;;  %v2985_v38 = vld [vmem:[%s4089_s1 + $0x4cc] ss:$16 sps:$4 sm:$0xff]  }
  0x61   :  { %2221 = vmatprep.subr.bf16.mxu1 %v2895_v39  ;;  %v2984_v39 = vld [vmem:[%s4089_s1 + $0x4e0] ss:$16 sps:$4 sm:$0xff]  }
  0x63   :  { %2031 = vmatpush1.bf16.msra.mxu0 %v2894_v40  ;;  %v2987_v40 = vld [vmem:[%s4089_s1 + $0x4c8] ss:$16 sps:$4 sm:$0xff]  }
  0x64   :  { %2223 = vmatpush1.bf16.msra.mxu1 %v2897_v41  ;;  %2033 = vmatprep.subr.bf16.mxu0 %v2898_v42  ;;  %v2988_v41 = vld [vmem:[%s4089_s1 + $0x504] ss:$16 sps:$4 sm:$0xff]   ;;  %v2991_v42 = vld [vmem:[%s4089_s1 + $0x4ec] ss:$16 sps:$4 sm:$0xff]  }
  0x65   :  { %2225 = vmatprep.subr.bf16.mxu1 %v2901_v43 }
  0x67   :  { %2035 = vmatpush1.bf16.msra.mxu0 %v2900_v44 }
  0x68   :  { %2227 = vmatpush1.bf16.msra.mxu1 %v2903_v45  ;;  %2037 = vmatprep.subr.bf16.mxu0 %v2904_v46 }
  0x69   :  { %2229 = vmatprep.subr.bf16.mxu1 %v2907_v47 }
  0x6b   :  { %2039 = vmatpush1.bf16.msra.mxu0 %v2906_v48 }
  0x6c   :  { %2231 = vmatpush1.bf16.msra.mxu1 %v2909_v49  ;;  %2041 = vmatprep.subr.bf16.mxu0 %v2910_v50 }
  0x6d   :  { %2233 = vmatprep.subr.bf16.mxu1 %v2913_v51 }
  0x6f   :  { %2043 = vmatpush1.bf16.msra.mxu0 %v2912_v52 }
  0x70   :  { %2235 = vmatpush1.bf16.msra.mxu1 %v2915_v53  ;;  %2045 = vmatprep.subr.bf16.mxu0 %v2916_v54 }
  0x71   :  { %2237 = vmatprep.subr.bf16.mxu1 %v2919_v55 }
  0x73   :  { %2047 = vmatpush1.bf16.msra.mxu0 %v2918_v56 }
  0x74   :  { %2239 = vmatpush1.bf16.msra.mxu1 %v2921_v57  ;;  %2049 = vmatprep.subr.bf16.mxu0 %v2922_v58 }
  0x75   :  { %2241 = vmatprep.subr.bf16.mxu1 %v2925_v59 }
  0x77   :  { %2051 = vmatpush1.bf16.msra.mxu0 %v2924_v60 }
  0x78   :  { %2243 = vmatpush1.bf16.msra.mxu1 %v2927_v61  ;;  %2053 = vmatprep.subr.bf16.mxu0 %v2928_v62 }
  0x79   :  { %2245 = vmatprep.subr.bf16.mxu1 %v2931_v63 }
  0x7b   :  { %2055 = vmatpush1.bf16.msra.mxu0 %v2930_v0 }
  0x7c   :  { %2247 = vmatpush1.bf16.msra.mxu1 %v2933_v1  ;;  %2057 = vmatprep.subr.bf16.mxu0 %v2934_v3 }
  0x7d   :  { %2249 = vmatprep.subr.bf16.mxu1 %v2937_v4 }
  0x7f   :  { %2059 = vmatpush1.bf16.msra.mxu0 %v2936_v5 }
  0x80   :  { %2251 = vmatpush1.bf16.msra.mxu1 %v2939_v6  ;;  %2061 = vmatprep.subr.bf16.mxu0 %v2940_v7 }
  0x81   :  { %2253 = vmatprep.subr.bf16.mxu1 %v2943_v8 }
  0x82   :  { %790 = vmatmul.mubr.f32.vlgmr.msra.gmra.mrb[0].mxu0 %v35_v11 }
  0x83   :  { %2063 = vmatpush1.bf16.msra.mxu0 %v2942_v9  ;;  %860 = vmatprep.mubr.f32.mxu0 %v38_v15 }
  0x84   :  { %2255 = vmatpush1.bf16.msra.mxu1 %v2945_v10  ;;  %2065 = vmatprep.subr.bf16.mxu0 %v2946_v12 }
  0x85   :  { %2257 = vmatprep.subr.bf16.mxu1 %v2949_v13 }
  0x87   :  { %1074 = vmatmul.mubr.f32.vlgmr.msra.gmra.mrb[2].mxu1 %v35_v11  ;;  %2067 = vmatpush1.bf16.msra.mxu0 %v2948_v14 }
  0x88   :  { %2259 = vmatpush1.bf16.msra.mxu1 %v2951_v16  ;;  %2069 = vmatprep.subr.bf16.mxu0 %v2952_v17 }
  0x89   :  { %2261 = vmatprep.subr.bf16.mxu1 %v2955_v18  ;;  %1144 = vmatprep.mubr.f32.mxu1 %v38_v15 }
  0x8b   :  { %2071 = vmatpush1.bf16.msra.mxu0 %v2954_v19 }
  0x8c   :  { %2263 = vmatpush1.bf16.msra.mxu1 %v2957_v20  ;;  %2073 = vmatprep.subr.bf16.mxu0 %v2958_v21 }
  0x8d   :  { %2265 = vmatprep.subr.bf16.mxu1 %v2961_v22 }
  0x8f   :  { %2075 = vmatpush1.bf16.msra.mxu0 %v2960_v23 }
  0x90   :  { %2267 = vmatpush1.bf16.msra.mxu1 %v2963_v24  ;;  %2077 = vmatprep.subr.bf16.mxu0 %v2964_v25 }
  0x91   :  { %2269 = vmatprep.subr.bf16.mxu1 %v2967_v26 }
  0x93   :  { %2079 = vmatpush1.bf16.msra.mxu0 %v2966_v27 }
  0x94   :  { %2271 = vmatpush1.bf16.msra.mxu1 %v2969_v28  ;;  %2081 = vmatprep.subr.bf16.mxu0 %v2970_v29 }
  0x95   :  { %2273 = vmatprep.subr.bf16.mxu1 %v2973_v30 }
  0x97   :  { %2083 = vmatpush1.bf16.msra.mxu0 %v2972_v31 }
  0x98   :  { %2275 = vmatpush1.bf16.msra.mxu1 %v2975_v32  ;;  %2085 = vmatprep.subr.bf16.mxu0 %v2976_v33 }
  0x99   :  { %2277 = vmatprep.subr.bf16.mxu1 %v2979_v34 }
  0x9b   :  { %2087 = vmatpush1.bf16.msra.mxu0 %v2978_v35 }
  0x9c   :  { %2279 = vmatpush1.bf16.msra.mxu1 %v2981_v36  ;;  %2089 = vmatprep.subr.bf16.mxu0 %v2982_v37 }
  0x9d   :  { %2281 = vmatprep.subr.bf16.mxu1 %v2985_v38 }
  0x9e   :  { %14 = vsyncpa [#allocation3], 0  ;;  %v2990_v43 = vld [vmem:[%s4089_s1 + $0x500] ss:$16 sps:$4 sm:$0xff]   ;;  %v2993_v44 = vld [vmem:[%s4089_s1 + $0x4e8] ss:$16 sps:$4 sm:$0xff]  }
  0x9f   :  { %2091 = vmatpush1.bf16.msra.mxu0 %v2984_v39  ;;  %v2994_v45 = vld [vmem:[%s4089_s1 + $0x524] ss:$16 sps:$4 sm:$0xff]   ;;  %v2997_v46 = vld [vmem:[%s4089_s1 + $0x50c] ss:$16 sps:$4 sm:$0xff]   ;;  %v2996_v47 = vld [vmem:[%s4089_s1 + $0x520] ss:$16 sps:$4 sm:$0xff]  }
  0xa0   :  { %2283 = vmatpush1.bf16.msra.mxu1 %v2987_v40  ;;  %2093 = vmatprep.subr.bf16.mxu0 %v2988_v41  ;;  %v2999_v48 = vld [vmem:[%s4089_s1 + $0x508] ss:$16 sps:$4 sm:$0xff]   ;;  %v3000_v49 = vld [vmem:[%s4089_s1 + $0x544] ss:$16 sps:$4 sm:$0xff]   ;;  %v3003_v50 = vld [vmem:[%s4089_s1 + $0x52c] ss:$16 sps:$4 sm:$0xff]  }
  0xa1   :  { %2285 = vmatprep.subr.bf16.mxu1 %v2991_v42  ;;  %v3002_v51 = vld [vmem:[%s4089_s1 + $0x540] ss:$16 sps:$4 sm:$0xff]   ;;  %v3005_v52 = vld [vmem:[%s4089_s1 + $0x528] ss:$16 sps:$4 sm:$0xff]   ;;  %v3006_v53 = vld [vmem:[%s4089_s1 + $0x564] ss:$16 sps:$4 sm:$0xff]  }
  0xa2   :  { %v3009_v54 = vld [vmem:[%s4089_s1 + $0x54c] ss:$16 sps:$4 sm:$0xff]   ;;  %v3008_v55 = vld [vmem:[%s4089_s1 + $0x560] ss:$16 sps:$4 sm:$0xff]   ;;  %v3011_v56 = vld [vmem:[%s4089_s1 + $0x548] ss:$16 sps:$4 sm:$0xff]  }
  0xa3   :  { %2095 = vmatpush1.bf16.msra.mxu0 %v2990_v43  ;;  %v3012_v57 = vld [vmem:[%s4089_s1 + $0x584] ss:$16 sps:$4 sm:$0xff]   ;;  %v3015_v58 = vld [vmem:[%s4089_s1 + $0x56c] ss:$16 sps:$4 sm:$0xff]   ;;  %v3014_v59 = vld [vmem:[%s4089_s1 + $0x580] ss:$16 sps:$4 sm:$0xff]  }
  0xa4   :  { %2287 = vmatpush1.bf16.msra.mxu1 %v2993_v44  ;;  %2097 = vmatprep.subr.bf16.mxu0 %v2994_v45  ;;  %v3017_v60 = vld [vmem:[%s4089_s1 + $0x568] ss:$16 sps:$4 sm:$0xff]   ;;  %v3018_v61 = vld [vmem:[%s4089_s1 + $0x5a4] ss:$16 sps:$4 sm:$0xff]   ;;  %v3021_v62 = vld [vmem:[%s4089_s1 + $0x58c] ss:$16 sps:$4 sm:$0xff]  }
  0xa5   :  { %2289 = vmatprep.subr.bf16.mxu1 %v2997_v46  ;;  %v3020_v63 = vld [vmem:[%s4089_s1 + $0x5a0] ss:$16 sps:$4 sm:$0xff]   ;;  %v3023_v0 = vld [vmem:[%s4089_s1 + $0x588] ss:$16 sps:$4 sm:$0xff]   ;;  %v3024_v1 = vld [vmem:[%s4089_s1 + $0x5c4] ss:$16 sps:$4 sm:$0xff]  }
  0xa6   :  { %v3027_v3 = vld [vmem:[%s4089_s1 + $0x5ac] ss:$16 sps:$4 sm:$0xff]   ;;  %v3026_v4 = vld [vmem:[%s4089_s1 + $0x5c0] ss:$16 sps:$4 sm:$0xff]   ;;  %v3029_v5 = vld [vmem:[%s4089_s1 + $0x5a8] ss:$16 sps:$4 sm:$0xff]  }
  0xa7   :  { %2099 = vmatpush1.bf16.msra.mxu0 %v2996_v47  ;;  %v3030_v6 = vld [vmem:[%s4089_s1 + $0x5e4] ss:$16 sps:$4 sm:$0xff]   ;;  %v3033_v7 = vld [vmem:[%s4089_s1 + $0x5cc] ss:$16 sps:$4 sm:$0xff]   ;;  %v3032_v8 = vld [vmem:[%s4089_s1 + $0x5e0] ss:$16 sps:$4 sm:$0xff]  }
  0xa8   :  { %2291 = vmatpush1.bf16.msra.mxu1 %v2999_v48  ;;  %2101 = vmatprep.subr.bf16.mxu0 %v3000_v49  ;;  %v3035_v9 = vld [vmem:[%s4089_s1 + $0x5c8] ss:$16 sps:$4 sm:$0xff]   ;;  %v3036_v10 = vld [vmem:[%s4089_s1 + $0x5ec] ss:$16 sps:$4 sm:$0xff]   ;;  %v37_v12 = vld [vmem:[%s4088_s0 + $0x20] sm:$0xff]  ;;  %vm1592_vm1 = vcmask 588800  }
  0xa9   :  { %2293 = vmatprep.subr.bf16.mxu1 %v3003_v50  ;;  %v3042_v11 = vld [vmem:[%s4091_s3 + $0x4] ss:$8 sps:$4 sm:$0xff]   ;;  %v3038_v13 = vld [vmem:[%s4089_s1 + $0x5e8] ss:$16 sps:$4 sm:$0xff]   ;;  %v3045_v16 = vld [vmem:[%s4091_s3 + $0x14] ss:$8 sps:$4 sm:$0xff]  }
  0xaa   :  { %v3044_v14 = vld [vmem:[%s4091_s3] ss:$8 sps:$4 sm:$0xff]   ;;  %v3039_v15 = vld [vmem:[%s4089_s1 + $0x60c] ss:$16 sps:$4 sm:$0xff]   ;;  %v3047_v18 = vld [vmem:[%s4091_s3 + $0x10] ss:$8 sps:$4 sm:$0xff]  }
  0xab   :  { %2103 = vmatpush1.bf16.msra.mxu0 %v3002_v51  ;;  %v3041_v17 = vld [vmem:[%s4089_s1 + $0x608] ss:$16 sps:$4 sm:$0xff]   ;;  %v3048_v19 = vld [vmem:[%s4091_s3 + $0x24] ss:$8 sps:$4 sm:$0xff]   ;;  %v3051_v21 = vld [vmem:[%s4091_s3 + $0x34] ss:$8 sps:$4 sm:$0xff]  }
  0xac   :  { %2295 = vmatpush1.bf16.msra.mxu1 %v3005_v52  ;;  %2105 = vmatprep.subr.bf16.mxu0 %v3006_v53  ;;  %v3050_v20 = vld [vmem:[%s4091_s3 + $0x20] ss:$8 sps:$4 sm:$0xff]   ;;  %v3053_v22 = vld [vmem:[%s4091_s3 + $0x30] ss:$8 sps:$4 sm:$0xff]   ;;  %v3054_v23 = vld [vmem:[%s4091_s3 + $0x44] ss:$8 sps:$4 sm:$0xff]  }
  0xad   :  { %2297 = vmatprep.subr.bf16.mxu1 %v3009_v54  ;;  %v3117_v24 = vld [vmem:[%s4088_s0 + $0x30] sm:$0xff]  ;;  %v3056_v25 = vld [vmem:[%s4091_s3 + $0x40] ss:$8 sps:$4 sm:$0xff]   ;;  %v3060_v28 = vld [vmem:[%s4091_s3 + $0x64] ss:$8 sps:$4 sm:$0xff]   ;;  %v3143_v52 = vmov 0.0|0.0  }
  0xae   :  { %v3057_v26 = vld [vmem:[%s4091_s3 + $0x54] ss:$8 sps:$4 sm:$0xff]   ;;  %v3059_v27 = vld [vmem:[%s4091_s3 + $0x50] ss:$8 sps:$4 sm:$0xff]   ;;  %v3062_v29 = vld [vmem:[%s4091_s3 + $0x60] ss:$8 sps:$4 sm:$0xff]  }
  0xaf   :  { %2107 = vmatpush1.bf16.msra.mxu0 %v3008_v55  ;;  %v3063_v31 = vld [vmem:[%s4091_s3 + $0x74] ss:$8 sps:$4 sm:$0xff]   ;;  %v3065_v33 = vld [vmem:[%s4091_s3 + $0x70] ss:$8 sps:$4 sm:$0xff]   ;;  %v3066_v34 = vld [vmem:[%s4091_s3 + $0x84] ss:$8 sps:$4 sm:$0xff]  }
  0xb0   :  { %2299 = vmatpush1.bf16.msra.mxu1 %v3011_v56  ;;  %2109 = vmatprep.subr.bf16.mxu0 %v3012_v57  ;;  %v3068_v35 = vld [vmem:[%s4091_s3 + $0x80] ss:$8 sps:$4 sm:$0xff]   ;;  %v3069_v36 = vld [vmem:[%s4091_s3 + $0x94] ss:$8 sps:$4 sm:$0xff]   ;;  %v3071_v37 = vld [vmem:[%s4091_s3 + $0x90] ss:$8 sps:$4 sm:$0xff]  }
  0xb1   :  { %2301 = vmatprep.subr.bf16.mxu1 %v3015_v58  ;;  %v3072_v38 = vld [vmem:[%s4091_s3 + $0xa4] ss:$8 sps:$4 sm:$0xff]   ;;  %v3074_v39 = vld [vmem:[%s4091_s3 + $0xa0] ss:$8 sps:$4 sm:$0xff]   ;;  %v3075_v40 = vld [vmem:[%s4091_s3 + $0xb4] ss:$8 sps:$4 sm:$0xff]  }
  0xb2   :  { %v3077_v41 = vld [vmem:[%s4091_s3 + $0xb0] ss:$8 sps:$4 sm:$0xff]   ;;  %v3078_v42 = vld [vmem:[%s4091_s3 + $0xc4] ss:$8 sps:$4 sm:$0xff]   ;;  %v3080_v43 = vld [vmem:[%s4091_s3 + $0xc0] ss:$8 sps:$4 sm:$0xff]  }
  0xb3   :  { %2111 = vmatpush1.bf16.msra.mxu0 %v3014_v59  ;;  %v3081_v44 = vld [vmem:[%s4091_s3 + $0xd4] ss:$8 sps:$4 sm:$0xff]   ;;  %v3083_v45 = vld [vmem:[%s4091_s3 + $0xd0] ss:$8 sps:$4 sm:$0xff]   ;;  %v3084_v46 = vld [vmem:[%s4091_s3 + $0xe4] ss:$8 sps:$4 sm:$0xff]  }
  0xb4   :  { %2303 = vmatpush1.bf16.msra.mxu1 %v3017_v60  ;;  %2113 = vmatprep.subr.bf16.mxu0 %v3018_v61  ;;  %v3086_v47 = vld [vmem:[%s4091_s3 + $0xe0] ss:$8 sps:$4 sm:$0xff]   ;;  %v3087_v48 = vld [vmem:[%s4091_s3 + $0xf4] ss:$8 sps:$4 sm:$0xff]   ;;  %v3089_v49 = vld [vmem:[%s4091_s3 + $0xf0] ss:$8 sps:$4 sm:$0xff]  }
  0xb5   :  { %2305 = vmatprep.subr.bf16.mxu1 %v3021_v62  ;;  %v3090_v50 = vld [vmem:[%s4091_s3 + $0x104] ss:$8 sps:$4 sm:$0xff]   ;;  %v1874_v54 = vld [vmem:[%s4093_s5 + $0x10] sm:$0xff]   ;;  %v1875_v55 = vld [vmem:[%s4093_s5 + $0x18] sm:$0xff]   ;;  %vm1704_vm2 = vcmask 1043456   ;;  %vm3144_vm3 = vmmov 0  }
  0xb6   :  { %v1802_v51 = vld [vmem:[%s4093_s5] sm:$0xff]   ;;  %v1873_v53 = vld [vmem:[%s4093_s5 + $0x8] sm:$0xff]   ;;  %v1878_v58 = vld [vmem:[%s4093_s5 + $0x30] sm:$0xff]   ;;  %vm1700_vm4 = vcmask 818176  }
  0xb7   :  { %2115 = vmatpush1.bf16.msra.mxu0 %v3020_v63  ;;  %v1876_v56 = vld [vmem:[%s4093_s5 + $0x20] sm:$0xff]   ;;  %v1877_v57 = vld [vmem:[%s4093_s5 + $0x28] sm:$0xff]   ;;  %v1879_v59 = vld [vmem:[%s4093_s5 + $0x38] sm:$0xff]   ;;  %v630_v63 = vlaneseq }
  0xb8   :  { %2307 = vmatpush1.bf16.msra.mxu1 %v3023_v0  ;;  %2117 = vmatprep.subr.bf16.mxu0 %v3024_v1  ;;  %v1880_v60 = vld [vmem:[%s4093_s5 + $0x40] sm:$0xff]   ;;  %v1881_v61 = vld [vmem:[%s4093_s5 + $0x48] sm:$0xff]   ;;  %v1882_v62 = vld [vmem:[%s4093_s5 + $0x50] sm:$0xff]  }
  0xb9   :  { %2309 = vmatprep.subr.bf16.mxu1 %v3027_v3  ;;  %v3960_v0 = vshrl.u32 %v630_v63, 7  ;;  %v628_v3 = vld [vmem:[%s4090_s2] sm:$0xf] }
  0xbb   :  { %2119 = vmatpush1.bf16.msra.mxu0 %v3026_v4  ;;  %v632_v1 = vsub.s32 0, %v3960_v0  ;;  %v636_v4 = vsub.s32 1, %v3960_v0 }
  0xbc   :  { %2311 = vmatpush1.bf16.msra.mxu1 %v3029_v5  ;;  %2121 = vmatprep.subr.bf16.mxu0 %v3030_v6 }
  0xbd   :  { %2313 = vmatprep.subr.bf16.mxu1 %v3033_v7  ;;  %v633_v5 = vrot.slane %v628_v3, %v632_v1  ;;  %v637_v6 = vrot.slane %v628_v3, %v636_v4 }
  0xbf   :  { %2123 = vmatpush1.bf16.msra.mxu0 %v3032_v8 }
  0xc0   :  { %2315 = vmatpush1.bf16.msra.mxu1 %v3035_v9  ;;  %2325 = vmatprep.subr.bf16.mxu0 %v3042_v11 }
  0xc1   :  { %2317 = vmatprep.subr.bf16.mxu1 %v3036_v10 }
  0xc2   :  { %861 = vmatmul.mubr.f32.vlgmr.msra.gmra.mrb[0].mxu0 %v37_v12 }
  0xc3   :  { %2327 = vmatpush1.bf16.msra.mxu0 %v3044_v14  ;;  %v3092_v14 = vld [vmem:[%s4091_s3 + $0x100] ss:$8 sps:$4 sm:$0xff]  }
  0xc4   :  { %2319 = vmatpush1.bf16.msra.mxu1 %v3038_v13  ;;  %2329 = vmatprep.subr.bf16.mxu0 %v3045_v16 }
  0xc5   :  { %2321 = vmatprep.subr.bf16.mxu1 %v3039_v15  ;;  %v644_v15 = vsub.s32 3, %v3960_v0 }
  0xc7   :  { %1145 = vmatmul.mubr.f32.vlgmr.msra.gmra.mrb[2].mxu1 %v37_v12  ;;  %2331 = vmatpush1.bf16.msra.mxu0 %v3047_v18  ;;  %v3095_v18 = vld [vmem:[%s4091_s3 + $0x110] ss:$8 sps:$4 sm:$0xff]  }
  0xc8   :  { %2323 = vmatpush1.bf16.msra.mxu1 %v3041_v17  ;;  %1215 = vmatprep.mubr.f32.mxu1 %v3142_v2  ;;  %v3093_v17 = vld [vmem:[%s4091_s3 + $0x114] ss:$8 sps:$4 sm:$0xff]  }
  0xc9   :  { %2333 = vmatprep.subr.bf16.mxu0 %v3048_v19  ;;  %2424 = vmatprep.subr.bf16.mxu1 %v3143_v52  ;;  %v645_v19 = vrot.slane %v628_v3, %v644_v15 }
  0xcb   :  { %2335 = vmatpush1.bf16.msra.mxu0 %v3050_v20  ;;  %v3096_v20 = vld [vmem:[%s4091_s3 + $0x124] ss:$8 sps:$4 sm:$0xff]  }
  0xcc   :  { %2337 = vmatprep.subr.bf16.mxu0 %v3051_v21 }
  0xcf   :  { %1794 = vmatmul.mubr.msk.f32.vlgmr.msra.gmra.mrb[2].mxu1 %vm650_vm0, %v3117_v24  ;;  %2339 = vmatpush1.bf16.msra.mxu0 %v3053_v22  ;;  %v3098_v24 = vld [vmem:[%s4091_s3 + $0x120] ss:$8 sps:$4 sm:$0xff]  }
  0xd0   :  { %2341 = vmatprep.subr.bf16.mxu0 %v3054_v23  ;;  %2426 = vmatpush1.bf16.msra.mxu1 %v1802_v51 }
  0xd1   :  { %2427 = vmatprep.subr.bf16.mxu1 %v3143_v52 }
  0xd3   :  { %2343 = vmatpush1.bf16.msra.mxu0 %v3056_v25  ;;  %v3099_v25 = vld [vmem:[%s4091_s3 + $0x134] ss:$8 sps:$4 sm:$0xff]  }
  0xd4   :  { %2345 = vmatprep.subr.bf16.mxu0 %v3057_v26  ;;  %2429 = vmatpush1.bf16.msra.mxu1 %v1873_v53 }
  0xd5   :  { %2430 = vmatprep.subr.bf16.mxu1 %v3143_v52 }
  0xd7   :  { %2347 = vmatpush1.bf16.msra.mxu0 %v3059_v27  ;;  %v3101_v27 = vld [vmem:[%s4091_s3 + $0x130] ss:$8 sps:$4 sm:$0xff]  }
  0xd8   :  { %2349 = vmatprep.subr.bf16.mxu0 %v3060_v28  ;;  %2432 = vmatpush1.bf16.msra.mxu1 %v1874_v54  ;;  %v3102_v28 = vld [vmem:[%s4091_s3 + $0x144] ss:$8 sps:$4 sm:$0xff]  }
  0xd9   :  { %2433 = vmatprep.subr.bf16.mxu1 %v3143_v52 }
  0xda   :  { %v3854_v30 = vpop.f32.mrb[0].mxu1 }
  0xdb   :  { %v3859_v32 = vpop.f32.mrb[1].mxu1  ;;  %2351 = vmatpush1.bf16.msra.mxu0 %v3062_v29  ;;  %v3104_v29 = vld [vmem:[%s4091_s3 + $0x140] ss:$8 sps:$4 sm:$0xff]  }
  0xdc   :  { %2353 = vmatprep.subr.bf16.mxu0 %v3063_v31  ;;  %2435 = vmatpush1.bf16.msra.mxu1 %v1875_v55  ;;  %v3107_v31 = vld [vmem:[%s4091_s3 + $0x150] ss:$8 sps:$4 sm:$0xff]   ;;  %v1850_v55 = vld [vmem:[%s4095_s7] sm:$0xff]  }
  0xdd   :  { %2436 = vmatprep.subr.bf16.mxu1 %v3143_v52 }
  0xdf   :  { %2355 = vmatpush1.bf16.msra.mxu0 %v3065_v33  ;;  %v3110_v33 = vld [vmem:[%s4091_s3 + $0x160] ss:$8 sps:$4 sm:$0xff]  }
  0xe0   :  { %2357 = vmatprep.subr.bf16.mxu0 %v3066_v34  ;;  %2438 = vmatpush1.bf16.msra.mxu1 %v1876_v56  ;;  %v640_v34 = vsub.s32 2, %v3960_v0  ;;  %v1884_v56 = vld [vmem:[%s4095_s7 + $0x8] sm:$0xff]  }
  0xe1   :  { %2439 = vmatprep.subr.bf16.mxu1 %v3143_v52 }
  0xe3   :  { %2359 = vmatpush1.bf16.msra.mxu0 %v3068_v35  ;;  %v3111_v35 = vld [vmem:[%s4091_s3 + $0x174] ss:$8 sps:$4 sm:$0xff]  }
  0xe4   :  { %2361 = vmatprep.subr.bf16.mxu0 %v3069_v36  ;;  %2441 = vmatpush1.bf16.msra.mxu1 %v1877_v57  ;;  %v3113_v36 = vld [vmem:[%s4091_s3 + $0x170] ss:$8 sps:$4 sm:$0xff]  }
  0xe5   :  { %2442 = vmatprep.subr.bf16.mxu1 %v3143_v52  ;;  %v1885_v57 = vld [vmem:[%s4095_s7 + $0x10] sm:$0xff]  }
  0xe7   :  { %2363 = vmatpush1.bf16.msra.mxu0 %v3071_v37  ;;  %v641_v37 = vrot.slane %v628_v3, %v640_v34 }
  0xe8   :  { %2365 = vmatprep.subr.bf16.mxu0 %v3072_v38  ;;  %2444 = vmatpush1.bf16.msra.mxu1 %v1878_v58  ;;  %v3114_v38 = vld [vmem:[%s4091_s3 + $0x184] ss:$8 sps:$4 sm:$0xff]   ;;  %v1886_v58 = vld [vmem:[%s4095_s7 + $0x18] sm:$0xff]  }
  0xe9   :  { %2445 = vmatprep.subr.bf16.mxu1 %v3143_v52 }
  0xeb   :  { %2367 = vmatpush1.bf16.msra.mxu0 %v3074_v39  ;;  %v3116_v39 = vld [vmem:[%s4091_s3 + $0x180] ss:$8 sps:$4 sm:$0xff]  }
  0xec   :  { %2369 = vmatprep.subr.bf16.mxu0 %v3075_v40  ;;  %2447 = vmatpush1.bf16.msra.mxu1 %v1879_v59  ;;  %v1887_v59 = vld [vmem:[%s4095_s7 + $0x20] sm:$0xff]  }
  0xed   :  { %2448 = vmatprep.subr.bf16.mxu1 %v3143_v52 }
  0xef   :  { %2371 = vmatpush1.bf16.msra.mxu0 %v3077_v41 }
  0xf0   :  { %2373 = vmatprep.subr.bf16.mxu0 %v3078_v42  ;;  %2450 = vmatpush1.bf16.msra.mxu1 %v1880_v60  ;;  %v1883_v42 = vld [vmem:[%s4093_s5 + $0x58] sm:$0xff]   ;;  %v1888_v60 = vld [vmem:[%s4095_s7 + $0x28] sm:$0xff]  }
  0xf1   :  { %2451 = vmatprep.subr.bf16.mxu1 %v3143_v52 }
  0xf3   :  { %2375 = vmatpush1.bf16.msra.mxu0 %v3080_v43  ;;  %v1559_v43 = vld [vmem:[%s4093_s5 + $0x60] sm:$0xf] }
  0xf4   :  { %2377 = vmatprep.subr.bf16.mxu0 %v3081_v44  ;;  %2453 = vmatpush1.bf16.msra.mxu1 %v1881_v61  ;;  %v1584_v44 = vunpack.c.l.bf16 %v1559_v43  ;;  %v1679_v61 = vld [vmem:[%s4095_s7 + $0x30] sm:$0x3]  ;;  %s3145_s7 = smov [#allocation2]  }
  0xf5   :  { %2454 = vmatprep.subr.bf16.mxu1 %v3143_v52  ;;  %s1785_s22 = sshll.u32 %s3145_s7, 4  ;;  %s1786_s22 = int_to_ptr.vmem [resolvable:$true] %s1785_s22 }
  0xf6   :  { %s3118_s23 = scalar_lea.vmem %s1786_s22, 128  ;;  %p3123_p1 = scmp.lt.s32.totalorder %s1786_s22, %s1786_s22 }
  0xf7   :  { %2379 = vmatpush1.bf16.msra.mxu0 %v3083_v45  ;;  %v1376_v45 = vld [vmem:[%s4092_s4] sm:$0x3]  ;;  %p3119_p0 = scmp.ne.s32.totalorder %s1786_s22, %s3118_s23  ;;  %p3124_p2 = scmp.lt.s32.totalorder %s3118_s23, %s3118_s23 }
  0xf8   :  { %2381 = vmatprep.subr.bf16.mxu0 %v3084_v46  ;;  %2456 = vmatpush1.bf16.msra.mxu1 %v1882_v62  ;;  %v1381_v46 = vrot.slane %v1376_v45, %v632_v1  ;;  %v1692_v62 = vunpack.c.l.bf16 %v1679_v61 }
  0xf9   :  { %2457 = vmatprep.subr.bf16.mxu1 %v3143_v52  ;;  %p3125_p3 = por %p3124_p2, %p3123_p1 }
  0xfb   :  { %2383 = vmatpush1.bf16.msra.mxu0 %v3086_v47  ;;  %v1385_v47 = vrot.slane %v1376_v45, %v636_v4  ;;  %v1798_v4 = vld [vmem:[%s4096_s8] ss:$0 sm:$0xff]  ;;  %p3126_p4 = pnand %p3125_p3, %p3119_p0 }
  0xfc   :  { %2385 = vmatprep.subr.bf16.mxu0 %v3087_v48  ;;  %2459 = vmatpush1.bf16.msra.mxu1 %v1883_v42 }
  0xfd   :  { %1644 = vmatprep.subr.mxu1 %v3142_v2 }
  0xff   :  { %2387 = vmatpush1.bf16.msra.mxu0 %v3089_v49 }
 0x100   :  { %2389 = vmatprep.subr.bf16.mxu0 %v3090_v50  ;;  %1645 = vmatpush1.msra.mxu1 %v1584_v44 }
 0x101   :  { %2460 = vmatprep.subr.bf16.mxu1 %v3143_v52 }
 0x195   :  { %v862_v7 = vpop.f32.mrb[0].mxu0 }
 0x196   :  { %v2478_v8 = vadd.f32 %v862_v7, %v633_v5  ;;  %v864_v9 = vpop.f32.mrb[1].mxu0 }
 0x197   :  { %v2480_v10 = vadd.f32 %v864_v9, %v637_v6 }
 0x198   :  { %v2479_v11 = vadd.f32 %v2478_v8, %v3854_v30  ;;  %v3105_v30 = vld [vmem:[%s4091_s3 + $0x154] ss:$8 sps:$4 sm:$0xff]  }
 0x199   :  { %v2481_v12 = vadd.f32 %v2480_v10, %v3859_v32  ;;  %v3108_v32 = vld [vmem:[%s4091_s3 + $0x164] ss:$8 sps:$4 sm:$0xff]  }
 0x19a   :  { %v1222_v16 = vmax.f32 %v2479_v11, 0.0 }
 0x19b   :  { %v1223_v13 = vmax.f32 %v2481_v12, 0.0 }
 0x19d   :  { %1455 = vmatprep.mubr.f32.mxu0 %v1223_v13 }
 0x19e   :  { %1456 = vmatmul.mubr.f32.vlgmr.msra.gmra.mrb[2].mxu0 %v1222_v16 }
 0x19f   :  { %2391 = vmatpush1.bf16.msra.mxu0 %v3092_v14 }
 0x1a0   :  { %2393 = vmatprep.subr.bf16.mxu0 %v3093_v17 }
 0x1a2   :  { %v1217_v21 = vpop.f32.mrb[2].mxu1 }
 0x1a3   :  { %v1219_v22 = vpop.f32.mrb[3].mxu1  ;;  %2395 = vmatpush1.bf16.msra.mxu0 %v3095_v18  ;;  %v2482_v40 = vadd.f32 %v1217_v21, %v641_v37 }
 0x1a4   :  { %v2483_v23 = vadd.f32 %v1219_v22, %v645_v19  ;;  %2397 = vmatprep.subr.bf16.mxu0 %v3096_v20 }
 0x1a5   :  { %v1224_v41 = vmax.f32 %v2482_v40, 0.0 }
 0x1a6   :  { %v1225_v26 = vmax.f32 %v2483_v23, 0.0 }
 0x1a7   :  { %2399 = vmatpush1.bf16.msra.mxu0 %v3098_v24 }
 0x1a8   :  { %1795 = vmatprep.mubr.msk.f32.mxu0 %vm650_vm0, %v1225_v26  ;;  %2401 = vmatprep.subr.bf16.mxu0 %v3099_v25 }
 0x1ab   :  { %2403 = vmatpush1.bf16.msra.mxu0 %v3101_v27 }
 0x1ac   :  { %2405 = vmatprep.subr.bf16.mxu0 %v3102_v28 }
 0x1af   :  { %2407 = vmatpush1.bf16.msra.mxu0 %v3104_v29 }
 0x1b0   :  { %2409 = vmatprep.subr.bf16.mxu0 %v3105_v30 }
 0x1b3   :  { %2411 = vmatpush1.bf16.msra.mxu0 %v3107_v31 }
 0x1b4   :  { %2413 = vmatprep.subr.bf16.mxu0 %v3108_v32 }
 0x1b7   :  { %2415 = vmatpush1.bf16.msra.mxu0 %v3110_v33 }
 0x1b8   :  { %2417 = vmatprep.subr.bf16.mxu0 %v3111_v35 }
 0x1bb   :  { %2419 = vmatpush1.bf16.msra.mxu0 %v3113_v36 }
 0x1bc   :  { %2421 = vmatprep.subr.bf16.mxu0 %v3114_v38 }
 0x1bf   :  { %2423 = vmatpush1.bf16.msra.mxu0 %v3116_v39 }
 0x1c2   :  { %1527 = vmatmul.mubr.f32.vlgmr.msra.gmra.mrb[2].mxu0 %v1224_v41 }
 0x295   :  { %v1528_v48 = vpop.f32.mrb[2].mxu0 }
 0x296   :  { %v2484_v49 = vadd.f32 %v1528_v48, %v1381_v46  ;;  %v1530_v50 = vpop.f32.mrb[3].mxu0 }
 0x297   :  { %v2485_v51 = vadd.f32 %v1530_v50, %v1385_v47 }
 0x298   :  { %v1533_v54 = vmax.f32 %v2484_v49, 0.0 }
 0x299   :  { %v1534_v53 = vmax.f32 %v2485_v51, 0.0 }
 0x29b   :  { %1797 = vmatprep.mubr.msk.f32.mxu1 %vm1592_vm1, %v1534_v53 }
 0x29c   :  { %1661 = vmatmul.mubr.f32.vlgmr.msra.gmra.mrb[4].mxu1 %v1533_v54 }
 0x29d   :  { %2462 = vmatpush3.bf16.msra.mxu1 %v1850_v55  ;;  %1929 = vmatprep.mubr.msk.f32.mxu1 %vm3144_vm3, %v3142_v2 }
 0x29e   :  { %2463 = vmatprep.subr.bf16.mxu1 %v3143_v52 }
 0x2a1   :  { %2465 = vmatpush3.bf16.msra.mxu1 %v1884_v56 }
 0x2a2   :  { %2466 = vmatprep.subr.bf16.mxu1 %v3143_v52 }
 0x2a5   :  { %2468 = vmatpush3.bf16.msra.mxu1 %v1885_v57 }
 0x2a6   :  { %2469 = vmatprep.subr.bf16.mxu1 %v3143_v52 }
 0x2a9   :  { %2471 = vmatpush3.bf16.msra.mxu1 %v1886_v58 }
 0x2aa   :  { %2472 = vmatprep.subr.bf16.mxu1 %v3143_v52 }
 0x2ad   :  { %2474 = vmatpush3.bf16.msra.mxu1 %v1887_v59 }
 0x2ae   :  { %2475 = vmatprep.subr.bf16.mxu1 %v3143_v52  ;;  %v1796_v52 = vld [vmem:[%s4094_s6] ss:$0 sm:$0xff] }
 0x2b1   :  { %2477 = vmatpush3.bf16.msra.mxu1 %v1888_v60 }
 0x2b2   :  { %1927 = vmatprep.subr.mxu1 %v3142_v2 }
 0x2b5   :  { %1928 = vmatpush3.msk.msra.mxu1 %vm1704_vm2, %v1692_v62 }
 0x36f   :  { %v1662_v63 = vpop.f32.mrb[4].mxu1 }
 0x370   :  { %v1663_v0 = vadd.f32 %v1796_v52, %v1662_v63  ;;  %v1664_v1 = vpop.f32.mrb[5].mxu1 }
 0x372   :  { %v1666_v3 = vmax.f32 %v1663_v0, 0.0 }
 0x374   :  { %1930 = vmatmul.mubr.msk.f32.vlgmr.msra.gmra.mrb[6].mxu1 %vm1700_vm4, %v1666_v3 }
 0x447   :  { %v1774_v5 = vpop.f32.mrb[6].mxu1 }
 0x448   :  { %v1775_v6 = vadd.f32 %v1798_v4, %v1774_v5  ;;  %v1931_v7 = vpop.f32.mrb[7].mxu1 }
 0x44a   :  { %1778 = vst [vmem:[#allocation2] sm:$0xff] %v1775_v6 }
 0x44b   :  { %3129 = shalt.err (!%p3126_p4)
}
 0x44c   :  { %s3130_s25 = scalar_lea.hbm %s4097_s9, 128 }
 0x44d   :  { %p3131_p5 = scmp.ne.s32.totalorder %s4097_s9, %s3130_s25  ;;  %p3134_p6 = scmp.lt.u32.totalorder %s3130_s25, %s4097_s9 }
 0x44f   :  { %p3136_p7 = pnand %p3134_p6, %p3131_p5 }
 0x451   :  { %3139 = shalt.err (!%p3136_p7)
}
 0x452   :  { %1788 = dma.vmem_to_hbm [thread:$0]  %s1786_s22, 128, %s4097_s9, [#allocation3]  }
 0x453   :  { %3140 = dma.done.wait [#allocation3], 128  }
 0x454   :  { %3141 = vsyncadd [#allocation3], 4294967168 }
 0x455   :  { %1792 = vsyncpa [#allocation3], 1 }

</bundles_post_ra>
